<compile_context>
chip_gen: v7x
topology: tpu7x:2x2x1
jax: 0.10.0
libtpu: 0.0.40
codegen_flags: <defaults>
</compile_context>

<pallas_src>
import functools

import jax
import jax.numpy as jnp
from jax.experimental import pallas as pl
from jax.experimental.pallas import tpu as pltpu


def _round_up(v, m):
    return ((v + m - 1) // m) * m


def _graphgnn_kernel(a_ref, x_ref, w1_ref, b1_ref, w2_ref, b2_ref, out_ref):
    """Fused 2-layer GraphConv + relu. All operands are full (padded) VMEM blocks.

    a_ref : (Np, Np)        dense adjacency, A[dst, src] = edge multiplicity
    x_ref : (Np, Cin_p)     node features
    w1_ref: (Cin_p, 2*H_p)  [W_rel1 | W_root1]   b1_ref: (1, H_p)   (f32)
    w2_ref: (H_p, 2*O_p)    [W_rel2 | W_root2]   b2_ref: (1, O_p)   (f32)
    out   : (Np, O_p)       f32
    """
    cdt = a_ref.dtype                      # MXU-input dtype (f32 or bf16); accumulation is f32
    a = a_ref[...]
    hp = b1_ref.shape[-1]
    op = b2_ref.shape[-1]

    # ---- layer 1: one fused rel|root weight matmul, then aggregate the rel half ----
    t1 = jnp.dot(x_ref[...], w1_ref[...], preferred_element_type=jnp.float32)      # (Np, 2*Hp)
    h = (jnp.dot(a, t1[:, :hp].astype(cdt), preferred_element_type=jnp.float32)     # A @ (x W_rel1)
         + t1[:, hp:]                                                                # x W_root1
         + b1_ref[...])
    h = jnp.maximum(h, 0.0).astype(cdt)                                              # relu

    # ---- layer 2: same pattern (weight before the N^2 aggregation) ----
    t2 = jnp.dot(h, w2_ref[...], preferred_element_type=jnp.float32)               # (Np, 2*Op)
    o = (jnp.dot(a, t2[:, :op].astype(cdt), preferred_element_type=jnp.float32)     # A @ (h W_rel2)
         + t2[:, op:]                                                                # h W_root2
         + b2_ref[...])
    out_ref[...] = jnp.maximum(o, 0.0)                                               # relu


@functools.partial(jax.jit, static_argnames=("matmul_dtype",))
def graphgnn_forward(x, edge_index, params, *, matmul_dtype=jnp.float32):
    """x: (N, C_in) float32, edge_index: (2, E) int32 [row0 = src, row1 = dst].

    matmul_dtype: dtype of the MXU inputs (jnp.float32, or jnp.bfloat16 on v6e/v7x for
    ~2x MXU rate and half the VMEM/HBM bytes of the N x N adjacency); accumulation stays f32.
    """
    n, cin = x.shape
    hid = params["w_rel1"].shape[1]
    out_c = params["w_rel2"].shape[1]

    # Pad every dimension to a multiple of 128 -> lane-dense operands/output, full MXU tiles.
    np_ = _round_up(n, 128)
    cin_p = _round_up(cin, 128)
    hid_p = _round_up(hid, 128)
    out_p = _round_up(out_c, 128)

    # Densify edge_index -> adjacency (plain-JAX glue, fused under jit; scatter-add handles
    # duplicate edges).
    src, dst = edge_index[0], edge_index[1]
    adj = jnp.zeros((np_, np_), jnp.float32).at[dst, src].add(1.0)

    def pad2(w, r, c):
        return jnp.zeros((r, c), jnp.float32).at[:w.shape[0], :w.shape[1]].set(w)

    x_p = pad2(x, np_, cin_p)
    # Fused per-layer weights: [W_rel | W_root] hstacked so each layer is one weight matmul.
    w1 = jnp.concatenate([pad2(params["w_rel1"], cin_p, hid_p),
                          pad2(params["w_root1"], cin_p, hid_p)], axis=1)   # (Cin_p, 2*H_p)
    b1 = pad2(params["b_rel1"], 1, hid_p)
    w2 = jnp.concatenate([pad2(params["w_rel2"], hid_p, out_p),
                          pad2(params["w_root2"], hid_p, out_p)], axis=1)   # (H_p, 2*O_p)
    b2 = pad2(params["b_rel2"], 1, out_p)

    # MXU-input dtype (biases stay f32 and are added after the f32-accumulated matmuls).
    adj = adj.astype(matmul_dtype)
    x_p = x_p.astype(matmul_dtype)
    w1 = w1.astype(matmul_dtype)
    w2 = w2.astype(matmul_dtype)

    itemsize = jnp.dtype(matmul_dtype).itemsize
    flops = (2 * np_ * np_ * (hid_p + out_p)          # the two N^2 aggregations
             + 2 * np_ * cin_p * 2 * hid_p            # fused layer-1 weight matmul
             + 2 * np_ * hid_p * 2 * out_p)           # fused layer-2 weight matmul
    bytes_accessed = ((np_ * np_ + np_ * cin_p + cin_p * 2 * hid_p + hid_p * 2 * out_p) * itemsize
                      + (hid_p + out_p) * 4           # biases
                      + np_ * out_p * 4)              # output

    vmem = pl.BlockSpec(memory_space=pltpu.MemorySpace.VMEM)
    out_pad = pl.pallas_call(
        _graphgnn_kernel,
        out_shape=jax.ShapeDtypeStruct((np_, out_p), jnp.float32),
        in_specs=[vmem] * 6,
        out_specs=vmem,
        cost_estimate=pl.CostEstimate(flops=flops, transcendentals=0,
                                      bytes_accessed=bytes_accessed),
        # Works on every generation (v5e default scoped limit is only 16 MiB; v7x physical
        # VMEM is 64 MiB). The padded toy problem uses well under 1 MiB per operand.
        compiler_params=pltpu.CompilerParams(vmem_limit_bytes=int(32 * 2**20)),
    )(adj, x_p, w1, b1, w2, b2)

    return out_pad[:n, :out_c]


def make_params(key, in_channels, hidden_channels, out_channels):
    """Deterministic synthetic parameters (shapes match GraphConv's lin_rel / lin_root).

    Stored pre-transposed: (C_in, C_out) so the kernel does x @ W directly.
    lin_rel has a bias, lin_root does not (PyG GraphConv default).
    """
    ks = jax.random.split(key, 6)
    scale1 = 1.0 / jnp.sqrt(in_channels)
    scale2 = 1.0 / jnp.sqrt(hidden_channels)
    return {
        "w_rel1":  jax.random.uniform(ks[0], (in_channels, hidden_channels),
                                      jnp.float32, -scale1, scale1),
        "b_rel1":  jax.random.uniform(ks[1], (1, hidden_channels),
                                      jnp.float32, -scale1, scale1),
        "w_root1": jax.random.uniform(ks[2], (in_channels, hidden_channels),
                                      jnp.float32, -scale1, scale1),
        "w_rel2":  jax.random.uniform(ks[3], (hidden_channels, out_channels),
                                      jnp.float32, -scale2, scale2),
        "b_rel2":  jax.random.uniform(ks[4], (1, out_channels),
                                      jnp.float32, -scale2, scale2),
        "w_root2": jax.random.uniform(ks[5], (hidden_channels, out_channels),
                                      jnp.float32, -scale2, scale2),
    }


def _reference_forward(x, edge_index, params):
    """Pure-JAX reference implementing PyG GraphConv x2 + relu (canonical op order)."""
    n = x.shape[0]
    adj = jnp.zeros((n, n), dtype=jnp.float32).at[edge_index[1], edge_index[0]].add(1.0)
    h = adj @ x @ params["w_rel1"] + params["b_rel1"] + x @ params["w_root1"]
    h = jnp.maximum(h, 0.0)
    o = adj @ h @ params["w_rel2"] + params["b_rel2"] + h @ params["w_root2"]
    return jnp.maximum(o, 0.0)


if __name__ == "__main__":
    # Small, deterministic example: 16 nodes, 4 -> 32 -> 8 channels, 40 edges.
    key = jax.random.PRNGKey(0)
    k_x, k_e, k_p = jax.random.split(key, 3)

    num_nodes = 16
    in_channels, hidden_channels, out_channels = 4, 32, 8
    num_edges = 40

    x = jax.random.normal(k_x, (num_nodes, in_channels), dtype=jnp.float32)
    edge_index = jax.random.randint(k_e, (2, num_edges), 0, num_nodes, dtype=jnp.int32)
    params = make_params(k_p, in_channels, hidden_channels, out_channels)

    ref = _reference_forward(x, edge_index, params)

    # f32 MXU-input path.  Tolerance is sized for TPU default matmul precision (bf16 MXU
    # passes with f32 accumulation) since the kernel uses a mathematically identical but
    # differently associated op order (weight applied before the aggregation, fused weights).
    out_f32 = jax.block_until_ready(graphgnn_forward(x, edge_index, params))
    assert out_f32.shape == (num_nodes, out_channels)
    assert jnp.allclose(out_f32, ref, atol=5e-2, rtol=5e-2), "f32 kernel mismatch vs reference"

    # bf16 MXU-input fast path (v6e/v7x): adjacency multiplicities are exact in bf16,
    # accumulation stays f32.
    out_bf16 = jax.block_until_ready(
        graphgnn_forward(x, edge_index, params, matmul_dtype=jnp.bfloat16))
    assert out_bf16.shape == (num_nodes, out_channels)
    assert jnp.allclose(out_bf16, ref, atol=5e-2, rtol=5e-2), "bf16 kernel mismatch vs reference"

    print("KERNEL_OK")
</pallas_src>

<mosaic_0001>
module attributes {stable_mosaic.version = 11 : i64} {
  func.func @_graphgnn_kernel(%arg0: memref<128x128xf32, #tpu.memory_space<vmem>>, %arg1: memref<128x128xf32, #tpu.memory_space<vmem>>, %arg2: memref<128x256xf32, #tpu.memory_space<vmem>>, %arg3: memref<1x128xf32, #tpu.memory_space<vmem>>, %arg4: memref<128x256xf32, #tpu.memory_space<vmem>>, %arg5: memref<1x128xf32, #tpu.memory_space<vmem>>, %arg6: memref<128x128xf32, #tpu.memory_space<vmem>>) attributes {dimension_semantics = [], scalar_prefetch = 0 : i64, scratch_operands = 0 : i64, tpu.core_type = #tpu.core_type<tc>} {
    %c0 = arith.constant 0 : index
    %c0_0 = arith.constant 0 : index
    %0 = vector.load %arg0[%c0, %c0_0] : memref<128x128xf32, #tpu.memory_space<vmem>>, vector<128x128xf32>
    %c0_1 = arith.constant 0 : index
    %c0_2 = arith.constant 0 : index
    %1 = vector.load %arg1[%c0_1, %c0_2] : memref<128x128xf32, #tpu.memory_space<vmem>>, vector<128x128xf32>
    %c0_3 = arith.constant 0 : index
    %c0_4 = arith.constant 0 : index
    %2 = vector.load %arg2[%c0_3, %c0_4] : memref<128x256xf32, #tpu.memory_space<vmem>>, vector<128x256xf32>
    %cst = arith.constant dense<0.000000e+00> : vector<128x256xf32>
    %3 = tpu.matmul %1, %2, %cst {dimension_numbers = #tpu.dot_dimension_numbers<[1], [0], [0], [1], [0, 0, 1, 1], [], []>} : vector<128x128xf32>, vector<128x256xf32>, vector<128x256xf32> -> vector<128x256xf32>
    %4 = vector.extract_strided_slice %3 {offsets = [0, 0], sizes = [128, 128], strides = [1, 1]} : vector<128x256xf32> to vector<128x128xf32>
    %cst_5 = arith.constant dense<0.000000e+00> : vector<128x128xf32>
    %5 = tpu.matmul %0, %4, %cst_5 {dimension_numbers = #tpu.dot_dimension_numbers<[1], [0], [0], [1], [0, 0, 1, 1], [], []>} : vector<128x128xf32>, vector<128x128xf32>, vector<128x128xf32> -> vector<128x128xf32>
    %6 = vector.extract_strided_slice %3 {offsets = [0, 128], sizes = [128, 128], strides = [1, 1]} : vector<128x256xf32> to vector<128x128xf32>
    %7 = arith.addf %5, %6 : vector<128x128xf32>
    %c0_6 = arith.constant 0 : index
    %c0_7 = arith.constant 0 : index
    %8 = vector.load %arg3[%c0_6, %c0_7] : memref<1x128xf32, #tpu.memory_space<vmem>>, vector<1x128xf32>
    %9 = vector.broadcast %8 : vector<1x128xf32> to vector<128x128xf32>
    %10 = arith.addf %7, %9 : vector<128x128xf32>
    %cst_8 = arith.constant 0.000000e+00 : f32
    %11 = vector.broadcast %cst_8 : f32 to vector<128x128xf32>
    %12 = arith.maximumf %10, %11 : vector<128x128xf32>
    %c0_9 = arith.constant 0 : index
    %c0_10 = arith.constant 0 : index
    %13 = vector.load %arg4[%c0_9, %c0_10] : memref<128x256xf32, #tpu.memory_space<vmem>>, vector<128x256xf32>
    %cst_11 = arith.constant dense<0.000000e+00> : vector<128x256xf32>
    %14 = tpu.matmul %12, %13, %cst_11 {dimension_numbers = #tpu.dot_dimension_numbers<[1], [0], [0], [1], [0, 0, 1, 1], [], []>} : vector<128x128xf32>, vector<128x256xf32>, vector<128x256xf32> -> vector<128x256xf32>
    %15 = vector.extract_strided_slice %14 {offsets = [0, 0], sizes = [128, 128], strides = [1, 1]} : vector<128x256xf32> to vector<128x128xf32>
    %cst_12 = arith.constant dense<0.000000e+00> : vector<128x128xf32>
    %16 = tpu.matmul %0, %15, %cst_12 {dimension_numbers = #tpu.dot_dimension_numbers<[1], [0], [0], [1], [0, 0, 1, 1], [], []>} : vector<128x128xf32>, vector<128x128xf32>, vector<128x128xf32> -> vector<128x128xf32>
    %17 = vector.extract_strided_slice %14 {offsets = [0, 128], sizes = [128, 128], strides = [1, 1]} : vector<128x256xf32> to vector<128x128xf32>
    %18 = arith.addf %16, %17 : vector<128x128xf32>
    %c0_13 = arith.constant 0 : index
    %c0_14 = arith.constant 0 : index
    %19 = vector.load %arg5[%c0_13, %c0_14] : memref<1x128xf32, #tpu.memory_space<vmem>>, vector<1x128xf32>
    %20 = vector.broadcast %19 : vector<1x128xf32> to vector<128x128xf32>
    %21 = arith.addf %18, %20 : vector<128x128xf32>
    %cst_15 = arith.constant 0.000000e+00 : f32
    %22 = vector.broadcast %cst_15 : f32 to vector<128x128xf32>
    %23 = arith.maximumf %21, %22 : vector<128x128xf32>
    %c0_16 = arith.constant 0 : index
    %c0_17 = arith.constant 0 : index
    %24 = vector.load %arg6[%c0_16, %c0_17] : memref<128x128xf32, #tpu.memory_space<vmem>>, vector<128x128xf32>
    tpu.vector_store %arg6[%c0_16, %c0_17], %23 {strides = array<i32>} : memref<128x128xf32, #tpu.memory_space<vmem>>, vector<128x128xf32>,
    return
  }
}

</mosaic_0001>

<bundles_post_ra>
// kernel: graphgnn_forward.1
= control target key start
LH: loop header
LB: loop body
LE: loop exit
PB: predicated region body
PF: predicated region fallthrough
CT: control target
= control target key end

     0   :  { %v1136_v3 = vmov 0.0   ;;  %s1738_s2 = inlined_call_operand.vmem [shape: f32[128,256], index: 2, kind: input, shape index: {}]   ;;  %s1739_s1 = inlined_call_operand.vmem [shape: f32[128,128], index: 1, kind: input, shape index: {}]   ;;  %s1740_s0 = inlined_call_operand.vmem [shape: f32[128,128], index: 0, kind: input, shape index: {}]   ;;  %s1741_s4 = inlined_call_operand.vmem [shape: f32[128,256], index: 4, kind: input, shape index: {}]   ;;  %s1742_s3 = inlined_call_operand.vmem [shape: f32[1,128], index: 3, kind: input, shape index: {}]   ;;  %s1743_s5 = inlined_call_operand.vmem [shape: f32[1,128], index: 5, kind: input, shape index: {}]   ;;  %s1744_s6 = inlined_call_operand.vmem [shape: f32[128,128], index: 6, kind: output, shape index: {}]  }
   0x1   :  { %v56_v0 = vld [vmem:[%s1738_s2 + $0x8] sm:$0xff]  ;;  %v58_v1 = vld [vmem:[%s1738_s2 + $0x18] sm:$0xff]  ;;  %v55_v2 = vld [vmem:[%s1738_s2] sm:$0xff]  ;;  %151 = vmatprep.mubr.f32.mxu0 %v1136_v3 }
   0x2   :  { %v1007_v4 = vpack.c.bf16 %v58_v1, %v56_v0  ;;  %v57_v5 = vld [vmem:[%s1738_s2 + $0x10] sm:$0xff]  ;;  %v60_v6 = vld [vmem:[%s1738_s2 + $0x28] sm:$0xff]  ;;  %v62_v7 = vld [vmem:[%s1738_s2 + $0x38] sm:$0xff] }
   0x3   :  { %v1009_v8 = vpack.c.bf16 %v57_v5, %v55_v2  ;;  %v1011_v9 = vpack.c.bf16 %v62_v7, %v60_v6  ;;  %v59_v10 = vld [vmem:[%s1738_s2 + $0x20] sm:$0xff]  ;;  %v61_v11 = vld [vmem:[%s1738_s2 + $0x30] sm:$0xff]  ;;  %v64_v12 = vld [vmem:[%s1738_s2 + $0x48] sm:$0xff] }
   0x4   :  { %1008 = vmatprep.subr.bf16.mxu0 %v1007_v4  ;;  %v66_v13 = vld [vmem:[%s1738_s2 + $0x58] sm:$0xff]  ;;  %v1013_v14 = vpack.c.bf16 %v61_v11, %v59_v10  ;;  %v63_v16 = vld [vmem:[%s1738_s2 + $0x40] sm:$0xff]  ;;  %v65_v17 = vld [vmem:[%s1738_s2 + $0x50] sm:$0xff] }
   0x5   :  { %1010 = vmatpush1.bf16.msra.mxu0 %v1009_v8  ;;  %v1015_v15 = vpack.c.bf16 %v66_v13, %v64_v12  ;;  %v68_v18 = vld [vmem:[%s1738_s2 + $0x68] sm:$0xff]  ;;  %v70_v19 = vld [vmem:[%s1738_s2 + $0x78] sm:$0xff]  ;;  %v1017_v20 = vpack.c.bf16 %v65_v17, %v63_v16  ;;  %v67_v22 = vld [vmem:[%s1738_s2 + $0x60] sm:$0xff] }
   0x6   :  { %1012 = vmatprep.subr.bf16.mxu0 %v1011_v9  ;;  %v1019_v21 = vpack.c.bf16 %v70_v19, %v68_v18  ;;  %v69_v23 = vld [vmem:[%s1738_s2 + $0x70] sm:$0xff]  ;;  %v72_v24 = vld [vmem:[%s1738_s2 + $0x88] sm:$0xff]  ;;  %v74_v25 = vld [vmem:[%s1738_s2 + $0x98] sm:$0xff] }
   0x7   :  { %v1021_v26 = vpack.c.bf16 %v69_v23, %v67_v22  ;;  %v1023_v27 = vpack.c.bf16 %v74_v25, %v72_v24  ;;  %v71_v28 = vld [vmem:[%s1738_s2 + $0x80] sm:$0xff]  ;;  %v73_v29 = vld [vmem:[%s1738_s2 + $0x90] sm:$0xff]  ;;  %v76_v30 = vld [vmem:[%s1738_s2 + $0xa8] sm:$0xff] }
   0x8   :  { %v78_v31 = vld [vmem:[%s1738_s2 + $0xb8] sm:$0xff]  ;;  %v1025_v32 = vpack.c.bf16 %v73_v29, %v71_v28  ;;  %v75_v34 = vld [vmem:[%s1738_s2 + $0xa0] sm:$0xff]  ;;  %v77_v35 = vld [vmem:[%s1738_s2 + $0xb0] sm:$0xff] }
   0x9   :  { %1014 = vmatpush1.bf16.msra.mxu0 %v1013_v14  ;;  %v1027_v33 = vpack.c.bf16 %v78_v31, %v76_v30  ;;  %v80_v36 = vld [vmem:[%s1738_s2 + $0xc8] sm:$0xff]  ;;  %v82_v37 = vld [vmem:[%s1738_s2 + $0xd8] sm:$0xff]  ;;  %v1029_v38 = vpack.c.bf16 %v77_v35, %v75_v34  ;;  %v79_v40 = vld [vmem:[%s1738_s2 + $0xc0] sm:$0xff] }
   0xa   :  { %1016 = vmatprep.subr.bf16.mxu0 %v1015_v15  ;;  %v1031_v39 = vpack.c.bf16 %v82_v37, %v80_v36  ;;  %v81_v41 = vld [vmem:[%s1738_s2 + $0xd0] sm:$0xff]  ;;  %v84_v42 = vld [vmem:[%s1738_s2 + $0xe8] sm:$0xff]  ;;  %v86_v43 = vld [vmem:[%s1738_s2 + $0xf8] sm:$0xff] }
   0xb   :  { %v1033_v44 = vpack.c.bf16 %v81_v41, %v79_v40  ;;  %v1035_v45 = vpack.c.bf16 %v86_v43, %v84_v42  ;;  %v83_v46 = vld [vmem:[%s1738_s2 + $0xe0] sm:$0xff]  ;;  %v85_v47 = vld [vmem:[%s1738_s2 + $0xf0] sm:$0xff]  ;;  %v40_v50 = vld [vmem:[%s1739_s1 + $0x8] sm:$0xff] }
   0xc   :  { %v1037_v48 = vpack.c.bf16 %v85_v47, %v83_v46  ;;  %v39_v49 = vld [vmem:[%s1739_s1] sm:$0xff]  ;;  %v41_v51 = vld [vmem:[%s1739_s1 + $0x10] sm:$0xff]  ;;  %v42_v52 = vld [vmem:[%s1739_s1 + $0x18] sm:$0xff] }
   0xd   :  { %1018 = vmatpush1.bf16.msra.mxu0 %v1017_v20  ;;  %v43_v53 = vld [vmem:[%s1739_s1 + $0x20] sm:$0xff]  ;;  %v44_v54 = vld [vmem:[%s1739_s1 + $0x28] sm:$0xff]  ;;  %v45_v55 = vld [vmem:[%s1739_s1 + $0x30] sm:$0xff] }
   0xe   :  { %1020 = vmatprep.subr.bf16.mxu0 %v1019_v21  ;;  %v46_v56 = vld [vmem:[%s1739_s1 + $0x38] sm:$0xff]  ;;  %v47_v57 = vld [vmem:[%s1739_s1 + $0x40] sm:$0xff]  ;;  %v48_v58 = vld [vmem:[%s1739_s1 + $0x48] sm:$0xff] }
   0xf   :  { %v49_v59 = vld [vmem:[%s1739_s1 + $0x50] sm:$0xff]  ;;  %v50_v60 = vld [vmem:[%s1739_s1 + $0x58] sm:$0xff]  ;;  %v51_v61 = vld [vmem:[%s1739_s1 + $0x60] sm:$0xff] }
  0x10   :  { %v52_v62 = vld [vmem:[%s1739_s1 + $0x68] sm:$0xff]  ;;  %v53_v63 = vld [vmem:[%s1739_s1 + $0x70] sm:$0xff]  ;;  %v54_v0 = vld [vmem:[%s1739_s1 + $0x78] sm:$0xff] }
  0x11   :  { %1022 = vmatpush1.bf16.msra.mxu0 %v1021_v26  ;;  %v23_v1 = vld [vmem:[%s1740_s0] sm:$0xff]  ;;  %v433_v40 = vld [vmem:[%s1741_s4 + $0x8] sm:$0xff]  ;;  %v435_v41 = vld [vmem:[%s1741_s4 + $0x18] sm:$0xff] }
  0x12   :  { %1024 = vmatprep.subr.bf16.mxu0 %v1023_v27  ;;  %927 = vmatprep.mubr.f32.mxu1 %v23_v1  ;;  %v432_v46 = vld [vmem:[%s1741_s4] sm:$0xff]  ;;  %v434_v47 = vld [vmem:[%s1741_s4 + $0x10] sm:$0xff] }
  0x15   :  { %1026 = vmatpush1.bf16.msra.mxu0 %v1025_v32 }
  0x16   :  { %1028 = vmatprep.subr.bf16.mxu0 %v1027_v33 }
  0x19   :  { %1030 = vmatpush1.bf16.msra.mxu0 %v1029_v38 }
  0x1a   :  { %1032 = vmatprep.subr.bf16.mxu0 %v1031_v39 }
  0x1d   :  { %1034 = vmatpush1.bf16.msra.mxu0 %v1033_v44 }
  0x1e   :  { %1036 = vmatprep.subr.bf16.mxu0 %v1035_v45  ;;  %v1071_v45 = vpack.c.bf16 %v435_v41, %v433_v40  ;;  %v1502_v40 = vld [vmem:[%s1740_s0 + $0x58] sm:$0xff] }
  0x21   :  { %1038 = vmatpush1.bf16.msra.mxu0 %v1037_v48  ;;  %v437_v48 = vld [vmem:[%s1741_s4 + $0x28] sm:$0xff] }
  0x24   :  { %152 = vmatmul.mubr.f32.vlgmr.msra.gmra.mrb[0].mxu0 %v39_v49  ;;  %v439_v49 = vld [vmem:[%s1741_s4 + $0x38] sm:$0xff] }
  0x25   :  { %157 = vmatprep.mubr.f32.mxu0 %v1136_v3 }
  0x28   :  { %158 = vmatmul.mubr.f32.gmra.mrb[2].mxu0 %v40_v50  ;;  %v1388_v50 = vld [vmem:[%s1740_s0 + $0x8] sm:$0xff] }
  0x29   :  { %163 = vmatprep.mubr.f32.mxu0 %v1136_v3 }
  0x2c   :  { %164 = vmatmul.mubr.f32.gmra.mrb[4].mxu0 %v41_v51  ;;  %v1073_v51 = vpack.c.bf16 %v434_v47, %v432_v46  ;;  %v1526_v46 = vld [vmem:[%s1740_s0 + $0x78] sm:$0xff]  ;;  %v457_v47 = vld [vmem:[%s1741_s4 + $0xc8] sm:$0xff] }
  0x2d   :  { %169 = vmatprep.mubr.f32.mxu0 %v1136_v3 }
  0x30   :  { %170 = vmatmul.mubr.f32.gmra.mrb[6].mxu0 %v42_v52  ;;  %v1393_v52 = vld [vmem:[%s1740_s0 + $0x10] sm:$0xff] }
  0x31   :  { %175 = vmatprep.mubr.f32.mxu0 %v1136_v3 }
  0x34   :  { %176 = vmatmul.mubr.f32.gmra.mrb[8].mxu0 %v43_v53  ;;  %v1075_v53 = vpack.c.bf16 %v439_v49, %v437_v48  ;;  %v459_v48 = vld [vmem:[%s1741_s4 + $0xd8] sm:$0xff] }
  0x35   :  { %181 = vmatprep.mubr.f32.mxu0 %v1136_v3  ;;  %v1095_v49 = vpack.c.bf16 %v459_v48, %v457_v47 }
  0x38   :  { %182 = vmatmul.mubr.f32.gmra.mrb[10].mxu0 %v44_v54  ;;  %v436_v54 = vld [vmem:[%s1741_s4 + $0x20] sm:$0xff] }
  0x39   :  { %187 = vmatprep.mubr.f32.mxu0 %v1136_v3 }
  0x3c   :  { %188 = vmatmul.mubr.f32.gmra.mrb[12].mxu0 %v45_v55  ;;  %v438_v55 = vld [vmem:[%s1741_s4 + $0x30] sm:$0xff] }
  0x3d   :  { %193 = vmatprep.mubr.f32.mxu0 %v1136_v3 }
  0x40   :  { %194 = vmatmul.mubr.f32.gmra.mrb[14].mxu0 %v46_v56  ;;  %v441_v56 = vld [vmem:[%s1741_s4 + $0x48] sm:$0xff] }
  0x41   :  { %199 = vmatprep.mubr.f32.mxu0 %v1136_v3 }
  0x44   :  { %200 = vmatmul.mubr.f32.gmra.mrb[16].mxu0 %v47_v57  ;;  %v443_v57 = vld [vmem:[%s1741_s4 + $0x58] sm:$0xff] }
  0x45   :  { %205 = vmatprep.mubr.f32.mxu0 %v1136_v3 }
  0x48   :  { %206 = vmatmul.mubr.f32.gmra.mrb[18].mxu0 %v48_v58  ;;  %v1412_v58 = vld [vmem:[%s1740_s0 + $0x18] sm:$0xff] }
  0x49   :  { %211 = vmatprep.mubr.f32.mxu0 %v1136_v3 }
  0x4c   :  { %212 = vmatmul.mubr.f32.gmra.mrb[20].mxu0 %v49_v59  ;;  %v1077_v59 = vpack.c.bf16 %v438_v55, %v436_v54  ;;  %v461_v55 = vld [vmem:[%s1741_s4 + $0xe8] sm:$0xff] }
  0x4d   :  { %217 = vmatprep.mubr.f32.mxu0 %v1136_v3 }
  0x50   :  { %218 = vmatmul.mubr.f32.gmra.mrb[22].mxu0 %v50_v60  ;;  %v1417_v60 = vld [vmem:[%s1740_s0 + $0x20] sm:$0xff] }
  0x51   :  { %223 = vmatprep.mubr.f32.mxu0 %v1136_v3 }
  0x54   :  { %224 = vmatmul.mubr.f32.gmra.mrb[24].mxu0 %v51_v61  ;;  %v1079_v61 = vpack.c.bf16 %v443_v57, %v441_v56  ;;  %v463_v56 = vld [vmem:[%s1741_s4 + $0xf8] sm:$0xff] }
  0x55   :  { %229 = vmatprep.mubr.f32.mxu0 %v1136_v3  ;;  %v1099_v57 = vpack.c.bf16 %v463_v56, %v461_v55 }
  0x58   :  { %230 = vmatmul.mubr.f32.gmra.mrb[26].mxu0 %v52_v62  ;;  %v440_v62 = vld [vmem:[%s1741_s4 + $0x40] sm:$0xff] }
  0x59   :  { %235 = vmatprep.mubr.f32.mxu0 %v1136_v3 }
  0x5c   :  { %236 = vmatmul.mubr.f32.gmra.mrb[28].mxu0 %v53_v63  ;;  %v442_v63 = vld [vmem:[%s1741_s4 + $0x50] sm:$0xff] }
  0x5d   :  { %241 = vmatprep.mubr.f32.mxu0 %v1136_v3 }
  0x60   :  { %242 = vmatmul.mubr.f32.gmra.mrb[30].mxu0 %v54_v0  ;;  %v445_v0 = vld [vmem:[%s1741_s4 + $0x68] sm:$0xff] }
  0x61   :  { %983 = vmatprep.mubr.f32.mxu0 %v23_v1  ;;  %v447_v1 = vld [vmem:[%s1741_s4 + $0x78] sm:$0xff] }
  0xf7   :  { %v153_v2 = vpop.f32.mrb[0].mxu0 }
  0xf8   :  { %v1335_v4 = vpop.f32.mrb[1].mxu0 }
  0xfb   :  { %v159_v5 = vpop.f32.mrb[2].mxu0 }
  0xfc   :  { %v1039_v6 = vpack.c.bf16 %v159_v5, %v153_v2  ;;  %v1337_v7 = vpop.f32.mrb[3].mxu0  ;;  %v1436_v2 = vld [vmem:[%s1740_s0 + $0x28] sm:$0xff]  ;;  %v1081_v5 = vpack.c.bf16 %v442_v63, %v440_v62 }
  0xfe   :  { %1040 = vmatprep.subr.bf16.mxu1 %v1039_v6 }
  0xff   :  { %v165_v8 = vpop.f32.mrb[4].mxu0  ;;  %1042 = vmatpush3.bf16.msra.mxu1 %v1039_v6  ;;  %v1441_v6 = vld [vmem:[%s1740_s0 + $0x30] sm:$0xff] }
 0x100   :  { %v1339_v9 = vpop.f32.mrb[5].mxu0 }
 0x103   :  { %v171_v10 = vpop.f32.mrb[6].mxu0 }
 0x104   :  { %v1043_v11 = vpack.c.bf16 %v171_v10, %v165_v8  ;;  %v1341_v12 = vpop.f32.mrb[7].mxu0  ;;  %v1083_v8 = vpack.c.bf16 %v447_v1, %v445_v0  ;;  %v444_v10 = vld [vmem:[%s1741_s4 + $0x60] sm:$0xff] }
 0x105   :  { %v1558_v1 = vld [vmem:[%s1742_s3] ss:$0 sm:$0xff] }
 0x106   :  { %1044 = vmatprep.subr.bf16.mxu1 %v1043_v11 }
 0x107   :  { %v177_v13 = vpop.f32.mrb[8].mxu0  ;;  %1046 = vmatpush3.bf16.msra.mxu1 %v1043_v11  ;;  %v446_v11 = vld [vmem:[%s1741_s4 + $0x70] sm:$0xff] }
 0x108   :  { %v1343_v14 = vpop.f32.mrb[9].mxu0 }
 0x10b   :  { %v183_v15 = vpop.f32.mrb[10].mxu0 }
 0x10c   :  { %v1047_v16 = vpack.c.bf16 %v183_v15, %v177_v13  ;;  %v1345_v17 = vpop.f32.mrb[11].mxu0  ;;  %v449_v13 = vld [vmem:[%s1741_s4 + $0x88] sm:$0xff]  ;;  %v451_v15 = vld [vmem:[%s1741_s4 + $0x98] sm:$0xff] }
 0x10e   :  { %1048 = vmatprep.subr.bf16.mxu1 %v1047_v16 }
 0x10f   :  { %v189_v18 = vpop.f32.mrb[12].mxu0  ;;  %1050 = vmatpush3.bf16.msra.mxu1 %v1047_v16  ;;  %v1460_v16 = vld [vmem:[%s1740_s0 + $0x38] sm:$0xff] }
 0x110   :  { %v1347_v19 = vpop.f32.mrb[13].mxu0 }
 0x113   :  { %v195_v20 = vpop.f32.mrb[14].mxu0 }
 0x114   :  { %v1051_v21 = vpack.c.bf16 %v195_v20, %v189_v18  ;;  %v1349_v22 = vpop.f32.mrb[15].mxu0  ;;  %v1085_v18 = vpack.c.bf16 %v446_v11, %v444_v10  ;;  %v1465_v20 = vld [vmem:[%s1740_s0 + $0x40] sm:$0xff] }
 0x116   :  { %1052 = vmatprep.subr.bf16.mxu1 %v1051_v21 }
 0x117   :  { %v201_v23 = vpop.f32.mrb[16].mxu0  ;;  %1054 = vmatpush3.bf16.msra.mxu1 %v1051_v21  ;;  %v1087_v21 = vpack.c.bf16 %v451_v15, %v449_v13 }
 0x118   :  { %v1351_v24 = vpop.f32.mrb[17].mxu0 }
 0x11b   :  { %v207_v25 = vpop.f32.mrb[18].mxu0 }
 0x11c   :  { %v1055_v26 = vpack.c.bf16 %v207_v25, %v201_v23  ;;  %v1353_v27 = vpop.f32.mrb[19].mxu0  ;;  %v448_v23 = vld [vmem:[%s1741_s4 + $0x80] sm:$0xff]  ;;  %v450_v25 = vld [vmem:[%s1741_s4 + $0x90] sm:$0xff] }
 0x11e   :  { %1056 = vmatprep.subr.bf16.mxu1 %v1055_v26 }
 0x11f   :  { %v213_v28 = vpop.f32.mrb[20].mxu0  ;;  %1058 = vmatpush3.bf16.msra.mxu1 %v1055_v26  ;;  %v453_v26 = vld [vmem:[%s1741_s4 + $0xa8] sm:$0xff] }
 0x120   :  { %v1355_v29 = vpop.f32.mrb[21].mxu0 }
 0x123   :  { %v219_v30 = vpop.f32.mrb[22].mxu0 }
 0x124   :  { %v1059_v31 = vpack.c.bf16 %v219_v30, %v213_v28  ;;  %v1357_v32 = vpop.f32.mrb[23].mxu0  ;;  %v455_v28 = vld [vmem:[%s1741_s4 + $0xb8] sm:$0xff]  ;;  %v1484_v30 = vld [vmem:[%s1740_s0 + $0x48] sm:$0xff] }
 0x126   :  { %1060 = vmatprep.subr.bf16.mxu1 %v1059_v31 }
 0x127   :  { %v225_v33 = vpop.f32.mrb[24].mxu0  ;;  %1062 = vmatpush3.bf16.msra.mxu1 %v1059_v31  ;;  %v1089_v31 = vpack.c.bf16 %v450_v25, %v448_v23 }
 0x128   :  { %v1359_v34 = vpop.f32.mrb[25].mxu0 }
 0x12b   :  { %v231_v35 = vpop.f32.mrb[26].mxu0 }
 0x12c   :  { %v1063_v36 = vpack.c.bf16 %v231_v35, %v225_v33  ;;  %v1361_v37 = vpop.f32.mrb[27].mxu0  ;;  %v1489_v33 = vld [vmem:[%s1740_s0 + $0x50] sm:$0xff]  ;;  %v1091_v35 = vpack.c.bf16 %v455_v28, %v453_v26 }
 0x12e   :  { %1064 = vmatprep.subr.bf16.mxu1 %v1063_v36 }
 0x12f   :  { %v237_v38 = vpop.f32.mrb[28].mxu0  ;;  %1066 = vmatpush3.bf16.msra.mxu1 %v1063_v36  ;;  %v452_v36 = vld [vmem:[%s1741_s4 + $0xa0] sm:$0xff] }
 0x130   :  { %v1363_v39 = vpop.f32.mrb[29].mxu0 }
 0x133   :  { %v243_v42 = vpop.f32.mrb[30].mxu0 }
 0x134   :  { %v1067_v43 = vpack.c.bf16 %v243_v42, %v237_v38  ;;  %v1371_v44 = vpop.f32.mrb[31].mxu0  ;;  %v454_v38 = vld [vmem:[%s1741_s4 + $0xb0] sm:$0xff]  ;;  %v1507_v42 = vld [vmem:[%s1740_s0 + $0x60] sm:$0xff] }
 0x135   :  { %v1093_v41 = vpack.c.bf16 %v454_v38, %v452_v36 }
 0x136   :  { %1068 = vmatprep.subr.bf16.mxu1 %v1067_v43 }
 0x137   :  { %1070 = vmatpush3.bf16.msra.mxu1 %v1067_v43  ;;  %v1514_v43 = vld [vmem:[%s1740_s0 + $0x68] sm:$0xff] }
 0x138   :  { %1072 = vmatprep.subr.bf16.mxu1 %v1071_v45  ;;  %v1519_v45 = vld [vmem:[%s1740_s0 + $0x70] sm:$0xff] }
 0x13a   :  { %928 = vmatmul.mubr.f32.vlgmr.msra.gmra.mrb[0].mxu1 %v1388_v50 }
 0x13b   :  { %930 = vmatprep.mubr.f32.mxu1 %v1393_v52  ;;  %1074 = vmatpush1.bf16.msra.mxu1 %v1073_v51  ;;  %v456_v51 = vld [vmem:[%s1741_s4 + $0xc0] sm:$0xff] }
 0x13c   :  { %1076 = vmatprep.subr.bf16.mxu1 %v1075_v53  ;;  %v458_v53 = vld [vmem:[%s1741_s4 + $0xd0] sm:$0xff] }
 0x13d   :  { %v1097_v54 = vpack.c.bf16 %v458_v53, %v456_v51 }
 0x13e   :  { %931 = vmatmul.mubr.f32.gmra.mrb[2].mxu1 %v1412_v58 }
 0x13f   :  { %933 = vmatprep.mubr.f32.mxu1 %v1417_v60  ;;  %1078 = vmatpush1.bf16.msra.mxu1 %v1077_v59  ;;  %v460_v59 = vld [vmem:[%s1741_s4 + $0xe0] sm:$0xff] }
 0x140   :  { %1080 = vmatprep.subr.bf16.mxu1 %v1079_v61  ;;  %v462_v61 = vld [vmem:[%s1741_s4 + $0xf0] sm:$0xff] }
 0x141   :  { %v1101_v62 = vpack.c.bf16 %v462_v61, %v460_v59 }
 0x142   :  { %934 = vmatmul.mubr.f32.gmra.mrb[4].mxu1 %v1436_v2 }
 0x143   :  { %936 = vmatprep.mubr.f32.mxu1 %v1441_v6  ;;  %1082 = vmatpush1.bf16.msra.mxu1 %v1081_v5 }
 0x144   :  { %1084 = vmatprep.subr.bf16.mxu1 %v1083_v8 }
 0x146   :  { %937 = vmatmul.mubr.f32.gmra.mrb[6].mxu1 %v1460_v16 }
 0x147   :  { %939 = vmatprep.mubr.f32.mxu1 %v1465_v20  ;;  %1086 = vmatpush1.bf16.msra.mxu1 %v1085_v18 }
 0x148   :  { %1088 = vmatprep.subr.bf16.mxu1 %v1087_v21 }
 0x14a   :  { %940 = vmatmul.mubr.f32.gmra.mrb[8].mxu1 %v1484_v30 }
 0x14b   :  { %942 = vmatprep.mubr.f32.mxu1 %v1489_v33  ;;  %1090 = vmatpush1.bf16.msra.mxu1 %v1089_v31 }
 0x14c   :  { %1092 = vmatprep.subr.bf16.mxu1 %v1091_v35 }
 0x14e   :  { %943 = vmatmul.mubr.f32.gmra.mrb[10].mxu1 %v1502_v40 }
 0x14f   :  { %945 = vmatprep.mubr.f32.mxu1 %v1507_v42  ;;  %1094 = vmatpush1.bf16.msra.mxu1 %v1093_v41 }
 0x150   :  { %1096 = vmatprep.subr.bf16.mxu1 %v1095_v49 }
 0x152   :  { %946 = vmatmul.mubr.f32.gmra.mrb[12].mxu1 %v1514_v43 }
 0x153   :  { %948 = vmatprep.mubr.f32.mxu1 %v1519_v45  ;;  %1098 = vmatpush1.bf16.msra.mxu1 %v1097_v54 }
 0x154   :  { %1100 = vmatprep.subr.bf16.mxu1 %v1099_v57 }
 0x156   :  { %949 = vmatmul.mubr.f32.gmra.mrb[14].mxu1 %v1526_v46 }
 0x157   :  { %528 = vmatprep.mubr.f32.mxu1 %v1136_v3  ;;  %1102 = vmatpush1.bf16.msra.mxu1 %v1101_v62 }
 0x20d   :  { %v929_v63 = vpop.f32.mrb[0].mxu1 }
 0x20e   :  { %v320_v0 = vadd.f32 %v929_v63, %v1337_v7  ;;  %v314_v5 = vpop.f32.mrb[1].mxu1 }
 0x20f   :  { %v315_v8 = vadd.f32 %v314_v5, %v1335_v4 }
 0x210   :  { %v401_v18 = vadd.f32 %v1558_v1, %v320_v0 }
 0x211   :  { %v400_v10 = vadd.f32 %v1558_v1, %v315_v8  ;;  %v932_v11 = vpop.f32.mrb[2].mxu1 }
 0x212   :  { %v330_v13 = vadd.f32 %v932_v11, %v1341_v12  ;;  %v324_v15 = vpop.f32.mrb[3].mxu1  ;;  %v417_v28 = vmax.f32 %v401_v18, 0.0 }
 0x213   :  { %v416_v21 = vmax.f32 %v400_v10, 0.0  ;;  %v325_v23 = vadd.f32 %v324_v15, %v1339_v9 }
 0x214   :  { %v403_v9 = vadd.f32 %v1558_v1, %v330_v13 }
 0x215   :  { %v935_v7 = vpop.f32.mrb[4].mxu1  ;;  %529 = vmatmul.mubr.f32.vlgmr.msra.gmra.mrb[16].mxu1 %v416_v21  ;;  %v402_v4 = vadd.f32 %v1558_v1, %v325_v23 }
 0x216   :  { %v340_v25 = vadd.f32 %v935_v7, %v1345_v17  ;;  %v334_v26 = vpop.f32.mrb[5].mxu1  ;;  %534 = vmatprep.mubr.f32.mxu1 %v1136_v3 }
 0x217   :  { %v335_v31 = vadd.f32 %v334_v26, %v1343_v14  ;;  %v418_v38 = vmax.f32 %v402_v4, 0.0  ;;  %v419_v14 = vmax.f32 %v403_v9, 0.0 }
 0x219   :  { %v938_v35 = vpop.f32.mrb[6].mxu1  ;;  %535 = vmatmul.mubr.f32.gmra.mrb[18].mxu1 %v417_v28  ;;  %v404_v49 = vadd.f32 %v1558_v1, %v335_v31 }
 0x21a   :  { %v350_v12 = vadd.f32 %v938_v35, %v1349_v22  ;;  %v344_v36 = vpop.f32.mrb[7].mxu1  ;;  %540 = vmatprep.mubr.f32.mxu1 %v1136_v3 }
 0x21b   :  { %v345_v17 = vadd.f32 %v344_v36, %v1347_v19  ;;  %v405_v19 = vadd.f32 %v1558_v1, %v340_v25  ;;  %v420_v55 = vmax.f32 %v404_v49, 0.0 }
 0x21d   :  { %v941_v41 = vpop.f32.mrb[8].mxu1  ;;  %541 = vmatmul.mubr.f32.gmra.mrb[20].mxu1 %v418_v38  ;;  %v406_v61 = vadd.f32 %v1558_v1, %v345_v17 }
 0x21e   :  { %v360_v47 = vadd.f32 %v941_v41, %v1353_v27  ;;  %v354_v48 = vpop.f32.mrb[9].mxu1  ;;  %546 = vmatprep.mubr.f32.mxu1 %v1136_v3 }
 0x21f   :  { %v355_v22 = vadd.f32 %v354_v48, %v1351_v24  ;;  %v421_v24 = vmax.f32 %v405_v19, 0.0  ;;  %v422_v5 = vmax.f32 %v406_v61, 0.0 }
 0x221   :  { %v944_v51 = vpop.f32.mrb[10].mxu1  ;;  %547 = vmatmul.mubr.f32.gmra.mrb[22].mxu1 %v419_v14  ;;  %v408_v10 = vadd.f32 %v1558_v1, %v355_v22 }
 0x222   :  { %v370_v53 = vadd.f32 %v944_v51, %v1357_v32  ;;  %v364_v54 = vpop.f32.mrb[11].mxu1  ;;  %552 = vmatprep.mubr.f32.mxu1 %v1136_v3 }
 0x223   :  { %v365_v27 = vadd.f32 %v364_v54, %v1355_v29  ;;  %v407_v29 = vadd.f32 %v1558_v1, %v350_v12 }
 0x225   :  { %v947_v56 = vpop.f32.mrb[12].mxu1  ;;  %553 = vmatmul.mubr.f32.gmra.mrb[24].mxu1 %v420_v55  ;;  %v423_v8 = vmax.f32 %v407_v29, 0.0  ;;  %v410_v13 = vadd.f32 %v1558_v1, %v365_v27 }
 0x226   :  { %v380_v57 = vadd.f32 %v947_v56, %v1361_v37  ;;  %v374_v59 = vpop.f32.mrb[13].mxu1  ;;  %558 = vmatprep.mubr.f32.mxu1 %v1136_v3 }
 0x227   :  { %v375_v32 = vadd.f32 %v374_v59, %v1359_v34  ;;  %v409_v34 = vadd.f32 %v1558_v1, %v360_v47  ;;  %v426_v15 = vmax.f32 %v410_v13, 0.0 }
 0x228   :  { %v413_v23 = vadd.f32 %v1558_v1, %v380_v57 }
 0x229   :  { %v950_v62 = vpop.f32.mrb[14].mxu1  ;;  %559 = vmatmul.mubr.f32.gmra.mrb[26].mxu1 %v421_v24  ;;  %v425_v11 = vmax.f32 %v409_v34, 0.0  ;;  %v412_v21 = vadd.f32 %v1558_v1, %v375_v32 }
 0x22a   :  { %v390_v63 = vadd.f32 %v950_v62, %v1371_v44  ;;  %v384_v0 = vpop.f32.mrb[15].mxu1  ;;  %564 = vmatprep.mubr.f32.mxu1 %v1136_v3  ;;  %v424_v44 = vmax.f32 %v408_v10, 0.0  ;;  %v429_v25 = vmax.f32 %v413_v23, 0.0 }
 0x22b   :  { %v385_v37 = vadd.f32 %v384_v0, %v1363_v39  ;;  %v411_v39 = vadd.f32 %v1558_v1, %v370_v53  ;;  %v428_v7 = vmax.f32 %v412_v21, 0.0 }
 0x22c   :  { %v415_v28 = vadd.f32 %v1558_v1, %v390_v63 }
 0x22d   :  { %565 = vmatmul.mubr.f32.gmra.mrb[28].mxu1 %v422_v5  ;;  %v427_v18 = vmax.f32 %v411_v39, 0.0  ;;  %v414_v26 = vadd.f32 %v1558_v1, %v385_v37 }
 0x22e   :  { %570 = vmatprep.mubr.f32.mxu1 %v1136_v3  ;;  %v431_v31 = vmax.f32 %v415_v28, 0.0 }
 0x22f   :  { %v430_v4 = vmax.f32 %v414_v26, 0.0 }
 0x231   :  { %571 = vmatmul.mubr.f32.gmra.mrb[30].mxu1 %v423_v8 }
 0x232   :  { %576 = vmatprep.mubr.f32.mxu1 %v1136_v3 }
 0x235   :  { %577 = vmatmul.mubr.f32.gmra.mrb[32].mxu1 %v424_v44 }
 0x236   :  { %582 = vmatprep.mubr.f32.mxu1 %v1136_v3 }
 0x239   :  { %583 = vmatmul.mubr.f32.gmra.mrb[34].mxu1 %v425_v11 }
 0x23a   :  { %588 = vmatprep.mubr.f32.mxu1 %v1136_v3 }
 0x23d   :  { %589 = vmatmul.mubr.f32.gmra.mrb[36].mxu1 %v426_v15 }
 0x23e   :  { %594 = vmatprep.mubr.f32.mxu1 %v1136_v3 }
 0x241   :  { %595 = vmatmul.mubr.f32.gmra.mrb[38].mxu1 %v427_v18 }
 0x242   :  { %600 = vmatprep.mubr.f32.mxu1 %v1136_v3 }
 0x245   :  { %601 = vmatmul.mubr.f32.gmra.mrb[40].mxu1 %v428_v7 }
 0x246   :  { %606 = vmatprep.mubr.f32.mxu1 %v1136_v3 }
 0x249   :  { %607 = vmatmul.mubr.f32.gmra.mrb[42].mxu1 %v429_v25 }
 0x24a   :  { %612 = vmatprep.mubr.f32.mxu1 %v1136_v3 }
 0x24d   :  { %613 = vmatmul.mubr.f32.gmra.mrb[44].mxu1 %v430_v4 }
 0x24e   :  { %618 = vmatprep.mubr.f32.mxu1 %v1136_v3 }
 0x251   :  { %619 = vmatmul.mubr.f32.gmra.mrb[46].mxu1 %v431_v31 }
 0x2e8   :  { %v530_v35 = vpop.f32.mrb[16].mxu1 }
 0x2e9   :  { %v1606_v12 = vpop.f32.mrb[17].mxu1 }
 0x2ec   :  { %v536_v36 = vpop.f32.mrb[18].mxu1 }
 0x2ed   :  { %v1103_v9 = vpack.c.bf16 %v536_v36, %v530_v35  ;;  %v1608_v38 = vpop.f32.mrb[19].mxu1 }
 0x2ef   :  { %1104 = vmatprep.subr.bf16.mxu0 %v1103_v9 }
 0x2f0   :  { %v542_v17 = vpop.f32.mrb[20].mxu1  ;;  %1106 = vmatpush3.bf16.msra.mxu0 %v1103_v9 }
 0x2f1   :  { %v1610_v41 = vpop.f32.mrb[21].mxu1 }
 0x2f4   :  { %v548_v47 = vpop.f32.mrb[22].mxu1 }
 0x2f5   :  { %v1107_v1 = vpack.c.bf16 %v548_v47, %v542_v17  ;;  %v1612_v48 = vpop.f32.mrb[23].mxu1 }
 0x2f7   :  { %1108 = vmatprep.subr.bf16.mxu0 %v1107_v1 }
 0x2f8   :  { %v554_v3 = vpop.f32.mrb[24].mxu1  ;;  %1110 = vmatpush3.bf16.msra.mxu0 %v1107_v1 }
 0x2f9   :  { %v1614_v14 = vpop.f32.mrb[25].mxu1 }
 0x2fc   :  { %v560_v49 = vpop.f32.mrb[26].mxu1 }
 0x2fd   :  { %v1111_v22 = vpack.c.bf16 %v560_v49, %v554_v3  ;;  %v1616_v51 = vpop.f32.mrb[27].mxu1 }
 0x2ff   :  { %1112 = vmatprep.subr.bf16.mxu0 %v1111_v22 }
 0x300   :  { %v566_v53 = vpop.f32.mrb[28].mxu1  ;;  %1114 = vmatpush3.bf16.msra.mxu0 %v1111_v22 }
 0x301   :  { %v1618_v54 = vpop.f32.mrb[29].mxu1 }
 0x304   :  { %v572_v19 = vpop.f32.mrb[30].mxu1 }
 0x305   :  { %v1115_v55 = vpack.c.bf16 %v572_v19, %v566_v53  ;;  %v1620_v27 = vpop.f32.mrb[31].mxu1 }
 0x307   :  { %1116 = vmatprep.subr.bf16.mxu0 %v1115_v55 }
 0x308   :  { %v578_v56 = vpop.f32.mrb[32].mxu1  ;;  %1118 = vmatpush3.bf16.msra.mxu0 %v1115_v55 }
 0x309   :  { %v1622_v57 = vpop.f32.mrb[33].mxu1 }
 0x30c   :  { %v584_v59 = vpop.f32.mrb[34].mxu1 }
 0x30d   :  { %v1119_v24 = vpack.c.bf16 %v584_v59, %v578_v56  ;;  %v1624_v61 = vpop.f32.mrb[35].mxu1 }
 0x30f   :  { %1120 = vmatprep.subr.bf16.mxu0 %v1119_v24 }
 0x310   :  { %v590_v32 = vpop.f32.mrb[36].mxu1  ;;  %1122 = vmatpush3.bf16.msra.mxu0 %v1119_v24 }
 0x311   :  { %v1626_v62 = vpop.f32.mrb[37].mxu1 }
 0x314   :  { %v596_v63 = vpop.f32.mrb[38].mxu1 }
 0x315   :  { %v1123_v0 = vpack.c.bf16 %v596_v63, %v590_v32  ;;  %v1628_v29 = vpop.f32.mrb[39].mxu1 }
 0x317   :  { %1124 = vmatprep.subr.bf16.mxu0 %v1123_v0 }
 0x318   :  { %v602_v5 = vpop.f32.mrb[40].mxu1  ;;  %1126 = vmatpush3.bf16.msra.mxu0 %v1123_v0 }
 0x319   :  { %v1630_v37 = vpop.f32.mrb[41].mxu1 }
 0x31c   :  { %v608_v8 = vpop.f32.mrb[42].mxu1 }
 0x31d   :  { %v1127_v10 = vpack.c.bf16 %v608_v8, %v602_v5  ;;  %v1632_v34 = vpop.f32.mrb[43].mxu1 }
 0x31f   :  { %1128 = vmatprep.subr.bf16.mxu0 %v1127_v10 }
 0x320   :  { %v614_v44 = vpop.f32.mrb[44].mxu1  ;;  %1130 = vmatpush3.bf16.msra.mxu0 %v1127_v10 }
 0x321   :  { %v1634_v11 = vpop.f32.mrb[45].mxu1 }
 0x324   :  { %v620_v13 = vpop.f32.mrb[46].mxu1 }
 0x325   :  { %v1131_v39 = vpack.c.bf16 %v620_v13, %v614_v44  ;;  %v1636_v15 = vpop.f32.mrb[47].mxu1 }
 0x327   :  { %1132 = vmatprep.subr.bf16.mxu0 %v1131_v39 }
 0x328   :  { %1134 = vmatpush3.bf16.msra.mxu0 %v1131_v39 }
 0x32b   :  { %984 = vmatmul.mubr.f32.vlgmr.msra.gmra.mrb[32].mxu0 %v1388_v50 }
 0x32c   :  { %986 = vmatprep.mubr.f32.mxu0 %v1393_v52  ;;  %v1656_v52 = vld [vmem:[%s1743_s5] ss:$0 sm:$0xff] }
 0x32f   :  { %987 = vmatmul.mubr.f32.gmra.mrb[34].mxu0 %v1412_v58 }
 0x330   :  { %989 = vmatprep.mubr.f32.mxu0 %v1417_v60 }
 0x333   :  { %990 = vmatmul.mubr.f32.gmra.mrb[36].mxu0 %v1436_v2 }
 0x334   :  { %992 = vmatprep.mubr.f32.mxu0 %v1441_v6 }
 0x337   :  { %993 = vmatmul.mubr.f32.gmra.mrb[38].mxu0 %v1460_v16 }
 0x338   :  { %995 = vmatprep.mubr.f32.mxu0 %v1465_v20 }
 0x33b   :  { %996 = vmatmul.mubr.f32.gmra.mrb[40].mxu0 %v1484_v30 }
 0x33c   :  { %998 = vmatprep.mubr.f32.mxu0 %v1489_v33 }
 0x33f   :  { %999 = vmatmul.mubr.f32.gmra.mrb[42].mxu0 %v1502_v40 }
 0x340   :  { %1001 = vmatprep.mubr.f32.mxu0 %v1507_v42 }
 0x343   :  { %1002 = vmatmul.mubr.f32.gmra.mrb[44].mxu0 %v1514_v43 }
 0x344   :  { %1004 = vmatprep.mubr.f32.mxu0 %v1519_v45 }
 0x347   :  { %1005 = vmatmul.mubr.f32.gmra.mrb[46].mxu0 %v1526_v46 }
 0x3fe   :  { %v985_v50 = vpop.f32.mrb[32].mxu0 }
 0x3ff   :  { %v697_v58 = vadd.f32 %v985_v50, %v1608_v38  ;;  %v691_v60 = vpop.f32.mrb[33].mxu0 }
 0x400   :  { %v692_v2 = vadd.f32 %v691_v60, %v1606_v12 }
 0x401   :  { %v778_v6 = vadd.f32 %v1656_v52, %v697_v58 }
 0x402   :  { %v777_v16 = vadd.f32 %v1656_v52, %v692_v2  ;;  %v988_v20 = vpop.f32.mrb[34].mxu0 }
 0x403   :  { %v794_v30 = vmax.f32 %v778_v6, 0.0  ;;  %v707_v33 = vadd.f32 %v988_v20, %v1612_v48  ;;  %v701_v40 = vpop.f32.mrb[35].mxu0 }
 0x404   :  { %v793_v42 = vmax.f32 %v777_v16, 0.0  ;;  %v702_v43 = vadd.f32 %v701_v40, %v1610_v41 }
 0x405   :  { %810 = vst [vmem:[%s1744_s6 + $0x8] sm:$0xff] %v794_v30  ;;  %v780_v45 = vadd.f32 %v1656_v52, %v707_v33 }
 0x406   :  { %809 = vst [vmem:[%s1744_s6] sm:$0xff] %v793_v42  ;;  %v779_v46 = vadd.f32 %v1656_v52, %v702_v43  ;;  %v991_v18 = vpop.f32.mrb[36].mxu0 }
 0x407   :  { %v796_v21 = vmax.f32 %v780_v45, 0.0  ;;  %v717_v23 = vadd.f32 %v991_v18, %v1616_v51  ;;  %v711_v7 = vpop.f32.mrb[37].mxu0 }
 0x408   :  { %v795_v25 = vmax.f32 %v779_v46, 0.0  ;;  %v712_v26 = vadd.f32 %v711_v7, %v1614_v14 }
 0x409   :  { %812 = vst [vmem:[%s1744_s6 + $0x18] sm:$0xff] %v796_v21  ;;  %v782_v28 = vadd.f32 %v1656_v52, %v717_v23 }
 0x40a   :  { %811 = vst [vmem:[%s1744_s6 + $0x10] sm:$0xff] %v795_v25  ;;  %v781_v4 = vadd.f32 %v1656_v52, %v712_v26  ;;  %v994_v31 = vpop.f32.mrb[38].mxu0 }
 0x40b   :  { %v798_v35 = vmax.f32 %v782_v28, 0.0  ;;  %v727_v12 = vadd.f32 %v994_v31, %v1620_v27  ;;  %v721_v36 = vpop.f32.mrb[39].mxu0 }
 0x40c   :  { %v797_v9 = vmax.f32 %v781_v4, 0.0  ;;  %v722_v38 = vadd.f32 %v721_v36, %v1618_v54 }
 0x40d   :  { %814 = vst [vmem:[%s1744_s6 + $0x28] sm:$0xff] %v798_v35  ;;  %v784_v17 = vadd.f32 %v1656_v52, %v727_v12 }
 0x40e   :  { %813 = vst [vmem:[%s1744_s6 + $0x20] sm:$0xff] %v797_v9  ;;  %v783_v41 = vadd.f32 %v1656_v52, %v722_v38  ;;  %v997_v47 = vpop.f32.mrb[40].mxu0 }
 0x40f   :  { %v800_v1 = vmax.f32 %v784_v17, 0.0  ;;  %v737_v48 = vadd.f32 %v997_v47, %v1624_v61  ;;  %v731_v3 = vpop.f32.mrb[41].mxu0 }
 0x410   :  { %v799_v14 = vmax.f32 %v783_v41, 0.0  ;;  %v732_v49 = vadd.f32 %v731_v3, %v1622_v57 }
 0x411   :  { %816 = vst [vmem:[%s1744_s6 + $0x38] sm:$0xff] %v800_v1  ;;  %v786_v22 = vadd.f32 %v1656_v52, %v737_v48 }
 0x412   :  { %815 = vst [vmem:[%s1744_s6 + $0x30] sm:$0xff] %v799_v14  ;;  %v785_v51 = vadd.f32 %v1656_v52, %v732_v49  ;;  %v1000_v53 = vpop.f32.mrb[42].mxu0 }
 0x413   :  { %v802_v54 = vmax.f32 %v786_v22, 0.0  ;;  %v747_v19 = vadd.f32 %v1000_v53, %v1628_v29  ;;  %v741_v55 = vpop.f32.mrb[43].mxu0 }
 0x414   :  { %v801_v27 = vmax.f32 %v785_v51, 0.0  ;;  %v742_v56 = vadd.f32 %v741_v55, %v1626_v62 }
 0x415   :  { %818 = vst [vmem:[%s1744_s6 + $0x48] sm:$0xff] %v802_v54  ;;  %v788_v57 = vadd.f32 %v1656_v52, %v747_v19 }
 0x416   :  { %817 = vst [vmem:[%s1744_s6 + $0x40] sm:$0xff] %v801_v27  ;;  %v787_v59 = vadd.f32 %v1656_v52, %v742_v56  ;;  %v1003_v24 = vpop.f32.mrb[44].mxu0 }
 0x417   :  { %v804_v61 = vmax.f32 %v788_v57, 0.0  ;;  %v757_v32 = vadd.f32 %v1003_v24, %v1632_v34  ;;  %v751_v63 = vpop.f32.mrb[45].mxu0 }
 0x418   :  { %v803_v0 = vmax.f32 %v787_v59, 0.0  ;;  %v752_v62 = vadd.f32 %v751_v63, %v1630_v37 }
 0x419   :  { %820 = vst [vmem:[%s1744_s6 + $0x58] sm:$0xff] %v804_v61  ;;  %v790_v29 = vadd.f32 %v1656_v52, %v757_v32 }
 0x41a   :  { %819 = vst [vmem:[%s1744_s6 + $0x50] sm:$0xff] %v803_v0  ;;  %v789_v5 = vadd.f32 %v1656_v52, %v752_v62  ;;  %v1006_v8 = vpop.f32.mrb[46].mxu0 }
 0x41b   :  { %v806_v10 = vmax.f32 %v790_v29, 0.0  ;;  %v767_v34 = vadd.f32 %v1006_v8, %v1636_v15  ;;  %v761_v44 = vpop.f32.mrb[47].mxu0 }
 0x41c   :  { %v805_v13 = vmax.f32 %v789_v5, 0.0  ;;  %v762_v37 = vadd.f32 %v761_v44, %v1634_v11 }
 0x41d   :  { %822 = vst [vmem:[%s1744_s6 + $0x68] sm:$0xff] %v806_v10  ;;  %v792_v39 = vadd.f32 %v1656_v52, %v767_v34 }
 0x41e   :  { %821 = vst [vmem:[%s1744_s6 + $0x60] sm:$0xff] %v805_v13  ;;  %v791_v50 = vadd.f32 %v1656_v52, %v762_v37 }
 0x41f   :  { %v808_v58 = vmax.f32 %v792_v39, 0.0 }
 0x420   :  { %v807_v60 = vmax.f32 %v791_v50, 0.0 }
 0x421   :  { %824 = vst [vmem:[%s1744_s6 + $0x78] sm:$0xff] %v808_v58 }
 0x422   :  { %823 = vst [vmem:[%s1744_s6 + $0x70] sm:$0xff] %v807_v60 }

</bundles_post_ra>
